<compile_context>
chip_gen: v6e
topology: v6e:2x2x1
jax: 0.10.0
libtpu: 0.0.40
codegen_flags: <defaults>
</compile_context>

<pallas_src>
import functools

import jax
import jax.numpy as jnp
from jax import lax
from jax.experimental import pallas as pl
from jax.experimental.pallas import tpu as pltpu

LANES = 128
ROW_ALIGN = 32          # covers min sublane tiling for f32(8) / bf16(16) / bool,int8(32)
MAX_BLOCK_ROWS = 2048   # 2048x128 block; see VMEM note above
MIN_SPLIT_ROWS = 256    # split into >=2 parallel blocks above this (v7x 2 TCs)


def _cdiv(a, b):
    return -(-a // b)


def _round_up(x, m):
    return _cdiv(x, m) * m


def _silog_partial_kernel(est_ref, gt_ref, mask_ref, out_ref, *,
                          valid_rows, block_rows, needs_tail_mask):
    """Per-block partial sums: out[0] = [sum d, sum d^2, count] as (3, 128)."""
    bi = pl.program_id(0)

    sel = mask_ref[...]
    if sel.dtype != jnp.bool_:
        sel = sel != 0

    def emit(sel_b):
        est = est_ref[...].astype(jnp.float32)
        gt = gt_ref[...].astype(jnp.float32)
        # Single log per element; unselected / garbage lanes see ratio == 1 -> d == 0.
        # Approx reciprocal runs on the EUP slot (free vs. the mem-bound stream);
        # its ~1e-3-level relative error is negligible after log + mean.
        ratio = jnp.where(sel_b, est * pl.reciprocal(gt, approx=True), 1.0)
        d = jnp.log(ratio)
        cnt = sel_b.astype(jnp.float32)
        # Sublane-axis reductions only: cross-vreg VPU adds + one XLU reduce each.
        out_ref[0, 0:1, :] = jnp.sum(d, axis=0, keepdims=True)
        out_ref[0, 1:2, :] = jnp.sum(d * d, axis=0, keepdims=True)
        out_ref[0, 2:3, :] = jnp.sum(cnt, axis=0, keepdims=True)

    if needs_tail_mask:
        last = pl.num_programs(0) - 1

        @pl.when(bi == last)
        def _():
            # Rows past the logical array are stale VMEM garbage (the DMA is
            # clipped); kill them so log-of-garbage never reaches the sums.
            row = lax.broadcasted_iota(jnp.int32, sel.shape, 0)
            in_bounds = (bi * block_rows + row) < valid_rows
            emit(jnp.logical_and(sel, in_bounds))

        @pl.when(bi != last)
        def _():
            emit(sel)
    else:
        emit(sel)


@functools.partial(jax.jit, static_argnames=("variance_focus",))
def silog_loss_pallas(depth_est, depth_gt, mask, *, variance_focus=0.85):
    # ---- glue: view as a lane-dense (rows, 128) slab (no copies) -----------
    est = depth_est.reshape(-1)                  # keep native dtype (f32 or bf16)
    gt = depth_gt.reshape(-1)
    msk = mask.reshape(-1)                       # bool streams as 1 B/elem, no cast

    n = est.shape[0]
    rows = _cdiv(n, LANES)
    lane_pad = rows * LANES - n
    if lane_pad:
        # TODO(synk): only hit when total element count is not a multiple of
        # 128; an in-kernel lane-iota mask on a 1-D layout would remove this
        # last copy pass too.
        est = jnp.pad(est, (0, lane_pad), constant_values=1)
        gt = jnp.pad(gt, (0, lane_pad), constant_values=1)
        msk = jnp.pad(msk, (0, lane_pad), constant_values=False)

    est2 = est.reshape(rows, LANES)
    gt2 = gt.reshape(rows, LANES)
    msk2 = msk.reshape(rows, LANES)

    # ---- balanced block sizing ---------------------------------------------
    if rows <= MIN_SPLIT_ROWS:
        num_blocks = 1
        block_rows = rows                        # block == full array dims: always legal
    else:
        num_blocks = max(_cdiv(rows, MAX_BLOCK_ROWS), 2)   # >=2 -> both v7x TCs
        block_rows = _round_up(_cdiv(rows, num_blocks), ROW_ALIGN)
        num_blocks = _cdiv(rows, block_rows)
    needs_tail_mask = (num_blocks * block_rows != rows)

    kernel = functools.partial(
        _silog_partial_kernel,
        valid_rows=rows,
        block_rows=block_rows,
        needs_tail_mask=needs_tail_mask,
    )

    if num_blocks >= 3:
        # Pure streaming kernel: a third buffer hides DMA turnaround jitter.
        in_blk = pl.BlockSpec((block_rows, LANES), lambda i: (i, 0),
                              pipeline_mode=pl.Buffered(3))
    else:
        in_blk = pl.BlockSpec((block_rows, LANES), lambda i: (i, 0))
    out_blk = pl.BlockSpec((1, 3, LANES), lambda i: (i, 0, 0))

    n_stream = rows * LANES
    cost = pl.CostEstimate(
        flops=8 * n_stream,
        transcendentals=2 * n_stream,            # log + approx reciprocal
        bytes_accessed=n_stream * (est2.dtype.itemsize + gt2.dtype.itemsize
                                   + msk2.dtype.itemsize)
        + num_blocks * 3 * LANES * 4,
    )

    partials = pl.pallas_call(
        kernel,
        out_shape=jax.ShapeDtypeStruct((num_blocks, 3, LANES), jnp.float32),
        grid_spec=pltpu.PrefetchScalarGridSpec(
            num_scalar_prefetch=0,
            grid=(num_blocks,),
            in_specs=[in_blk, in_blk, in_blk],
            out_specs=out_blk,
        ),
        compiler_params=pltpu.CompilerParams(
            dimension_semantics=("parallel",)),   # independent blocks -> 2 TCs on v7x
        cost_estimate=cost,
    )(est2, gt2, msk2)

    # Tiny final reduction + sqrt in plain JAX (f32 partial sums; fine up to
    # ~1e8 valid elements before the mean_d2 - mean_d^2 cancellation matters).
    sums = jnp.sum(partials, axis=(0, 2))        # (3,)
    sum_d, sum_d2, count = sums[0], sums[1], sums[2]
    mean_d = sum_d / count
    mean_d2 = sum_d2 / count
    # NOTE: like the PyTorch reference, the sqrt argument can go slightly
    # negative (NaN) if d is nearly constant and variance_focus ~ 1; kept
    # unclamped to match reference semantics.
    return jnp.sqrt(mean_d2 - variance_focus * mean_d * mean_d) * 10.0


def silog_loss_ref(depth_est, depth_gt, mask, variance_focus=0.85):
    """Pure-JAX reference matching the PyTorch masked-mean math."""
    m = mask.reshape(-1)
    d = jnp.where(m,
                  jnp.log(depth_est.reshape(-1).astype(jnp.float32))
                  - jnp.log(depth_gt.reshape(-1).astype(jnp.float32)),
                  0.0)
    cnt = jnp.sum(m.astype(jnp.float32))
    mean_d = jnp.sum(d) / cnt
    mean_d2 = jnp.sum(d * d) / cnt
    return jnp.sqrt(mean_d2 - variance_focus * mean_d ** 2) * 10.0


if __name__ == "__main__":
    key = jax.random.PRNGKey(0)
    variance_focus = 0.85  # deterministic "module parameter"
    # Approx reciprocal inside the kernel introduces a small (<<1%) deviation
    # in the final scalar; tolerances are set accordingly.
    RTOL = ATOL = 1e-2

    # --- small NCHW depth maps (single-block path) --------------------------
    k1, k2, k3, k4, k5, k6 = jax.random.split(key, 6)
    B, C, H, W = 2, 1, 16, 16
    depth_est = jax.random.uniform(k1, (B, C, H, W), jnp.float32, 1.0, 10.0)
    depth_gt = jax.random.uniform(k2, (B, C, H, W), jnp.float32, 1.0, 10.0)
    mask = jax.random.uniform(k3, (B, C, H, W), jnp.float32) > 0.3

    out = silog_loss_pallas(depth_est, depth_gt, mask,
                            variance_focus=variance_focus)
    out = jax.block_until_ready(out)
    ref = silog_loss_ref(depth_est, depth_gt, mask, variance_focus)
    assert jnp.allclose(out, ref, rtol=RTOL, atol=ATOL), (out, ref)

    # --- larger map: multi-block "parallel" grid + ragged in-kernel tail ----
    H2, W2 = 272, 272
    depth_est2 = jax.random.uniform(k4, (B, C, H2, W2), jnp.float32, 1.0, 10.0)
    depth_gt2 = jax.random.uniform(k5, (B, C, H2, W2), jnp.float32, 1.0, 10.0)
    mask2 = jax.random.uniform(k6, (B, C, H2, W2), jnp.float32) > 0.3

    out2 = silog_loss_pallas(depth_est2, depth_gt2, mask2,
                             variance_focus=variance_focus)
    out2 = jax.block_until_ready(out2)
    ref2 = silog_loss_ref(depth_est2, depth_gt2, mask2, variance_focus)
    assert jnp.allclose(out2, ref2, rtol=RTOL, atol=ATOL), (out2, ref2)

    print("KERNEL_OK")
</pallas_src>

<mosaic_0001>
module attributes {stable_mosaic.version = 11 : i64} {
  func.func @_silog_partial_kernel(%arg0: i32, %arg1: memref<4x128xf32, #tpu.memory_space<vmem>>, %arg2: memref<4x128xf32, #tpu.memory_space<vmem>>, %arg3: memref<4x128xi32, #tpu.memory_space<vmem>>, %arg4: memref<1x3x128xf32, #tpu.memory_space<vmem>>) attributes {dimension_semantics = [#tpu.dimension_semantics<parallel>], iteration_bounds = array<i64: 1>, scalar_prefetch = 0 : i64, scratch_operands = 0 : i64, tpu.core_type = #tpu.core_type<tc>, window_params = [{transform_indices = @transform_0, window_bounds = array<i64: 4, 128>}, {transform_indices = @transform_1, window_bounds = array<i64: 4, 128>}, {transform_indices = @transform_2, window_bounds = array<i64: 4, 128>}, {transform_indices = @transform_3, window_bounds = array<i64: 1, 3, 128>}]} {
    %c0 = arith.constant 0 : index
    %c0_0 = arith.constant 0 : index
    %0 = vector.load %arg3[%c0, %c0_0] : memref<4x128xi32, #tpu.memory_space<vmem>>, vector<4x128xi32>
    %cst = arith.constant dense<0> : vector<4x128xi32>
    %1 = arith.cmpi ne, %0, %cst : vector<4x128xi32>
    %c0_1 = arith.constant 0 : index
    %c0_2 = arith.constant 0 : index
    %2 = vector.load %arg1[%c0_1, %c0_2] : memref<4x128xf32, #tpu.memory_space<vmem>>, vector<4x128xf32>
    %c0_3 = arith.constant 0 : index
    %c0_4 = arith.constant 0 : index
    %3 = vector.load %arg2[%c0_3, %c0_4] : memref<4x128xf32, #tpu.memory_space<vmem>>, vector<4x128xf32>
    %4 = tpu.reciprocal %3 {approx = true} : vector<4x128xf32> -> vector<4x128xf32>
    %5 = arith.mulf %2, %4 : vector<4x128xf32>
    %cst_5 = arith.constant 1.000000e+00 : f32
    %6 = vector.broadcast %cst_5 : f32 to vector<4x128xf32>
    %7 = arith.select %1, %5, %6 : vector<4x128xi1>, vector<4x128xf32>
    %8 = math.log %7 : vector<4x128xf32>
    %9 = arith.extui %1 : vector<4x128xi1> to vector<4x128xi32>
    %10 = arith.sitofp %9 : vector<4x128xi32> to vector<4x128xf32>
    %cst_6 = arith.constant dense<0.000000e+00> : vector<128xf32>
    %11 = vector.multi_reduction <add>, %8, %cst_6 [0] : vector<4x128xf32> to vector<128xf32>
    %12 = vector.shape_cast %11 : vector<128xf32> to vector<1x128xf32>
    %c0_7 = arith.constant 0 : index
    %c0_8 = arith.constant 0 : index
    %c0_9 = arith.constant 0 : index
    %13 = vector.load %arg4[%c0_7, %c0_8, %c0_9] : memref<1x3x128xf32, #tpu.memory_space<vmem>>, vector<1x1x128xf32>
    %14 = vector.shape_cast %13 : vector<1x1x128xf32> to vector<1x128xf32>
    %15 = vector.shape_cast %12 : vector<1x128xf32> to vector<1x1x128xf32>
    tpu.vector_store %arg4[%c0_7, %c0_8, %c0_9], %15 {strides = array<i32>} : memref<1x3x128xf32, #tpu.memory_space<vmem>>, vector<1x1x128xf32>,
    %16 = arith.mulf %8, %8 : vector<4x128xf32>
    %cst_10 = arith.constant dense<0.000000e+00> : vector<128xf32>
    %17 = vector.multi_reduction <add>, %16, %cst_10 [0] : vector<4x128xf32> to vector<128xf32>
    %18 = vector.shape_cast %17 : vector<128xf32> to vector<1x128xf32>
    %c0_11 = arith.constant 0 : index
    %c1 = arith.constant 1 : index
    %c0_12 = arith.constant 0 : index
    %19 = vector.load %arg4[%c0_11, %c1, %c0_12] : memref<1x3x128xf32, #tpu.memory_space<vmem>>, vector<1x1x128xf32>
    %20 = vector.shape_cast %19 : vector<1x1x128xf32> to vector<1x128xf32>
    %21 = vector.shape_cast %18 : vector<1x128xf32> to vector<1x1x128xf32>
    tpu.vector_store %arg4[%c0_11, %c1, %c0_12], %21 {strides = array<i32>} : memref<1x3x128xf32, #tpu.memory_space<vmem>>, vector<1x1x128xf32>,
    %cst_13 = arith.constant dense<0.000000e+00> : vector<128xf32>
    %22 = vector.multi_reduction <add>, %10, %cst_13 [0] : vector<4x128xf32> to vector<128xf32>
    %23 = vector.shape_cast %22 : vector<128xf32> to vector<1x128xf32>
    %c0_14 = arith.constant 0 : index
    %c2 = arith.constant 2 : index
    %c0_15 = arith.constant 0 : index
    %24 = vector.load %arg4[%c0_14, %c2, %c0_15] : memref<1x3x128xf32, #tpu.memory_space<vmem>>, vector<1x1x128xf32>
    %25 = vector.shape_cast %24 : vector<1x1x128xf32> to vector<1x128xf32>
    %26 = vector.shape_cast %23 : vector<1x128xf32> to vector<1x1x128xf32>
    tpu.vector_store %arg4[%c0_14, %c2, %c0_15], %26 {strides = array<i32>} : memref<1x3x128xf32, #tpu.memory_space<vmem>>, vector<1x1x128xf32>,
    return
  }
  func.func @transform_0(%arg0: i32) -> (i32, i32) {
    %c0_i32 = arith.constant 0 : i32
    %c0_i32_0 = arith.constant 0 : i32
    return %arg0, %c0_i32 : i32, i32
  }
  func.func @transform_1(%arg0: i32) -> (i32, i32) {
    %c0_i32 = arith.constant 0 : i32
    %c0_i32_0 = arith.constant 0 : i32
    return %arg0, %c0_i32 : i32, i32
  }
  func.func @transform_2(%arg0: i32) -> (i32, i32) {
    %c0_i32 = arith.constant 0 : i32
    %c0_i32_0 = arith.constant 0 : i32
    return %arg0, %c0_i32 : i32, i32
  }
  func.func @transform_3(%arg0: i32) -> (i32, i32, i32) {
    %c0_i32 = arith.constant 0 : i32
    %c0_i32_0 = arith.constant 0 : i32
    %c0_i32_1 = arith.constant 0 : i32
    return %arg0, %c0_i32, %c0_i32_0 : i32, i32, i32
  }
}

</mosaic_0001>

<bundles_post_ra>
// kernel: silog_loss_pallas.1
= control target key start
LH: loop header
LB: loop body
LE: loop exit
PB: predicated region body
PF: predicated region fallthrough
CT: control target
= control target key end

     0   :  { %vm25_vm0 = vcmask 1043456   ;;  %v61_v2 = vmov 0.0   ;;  %s105_s1 = inlined_call_operand.vmem [shape: f32[4,128], index: 1, kind: input, shape index: {}]   ;;  %s106_s2 = inlined_call_operand.vmem [shape: s32[4,128], index: 2, kind: input, shape index: {}]   ;;  %s107_s0 = inlined_call_operand.vmem [shape: f32[4,128], index: 0, kind: input, shape index: {}]   ;;  %s108_s3 = inlined_call_operand.vmem [shape: f32[1,3,128], index: 3, kind: output, shape index: {}]  }
   0x1   :  { %v14_v0 = vld [vmem:[%s106_s2] sm:$0xf] }
   0x2   :  { %v17_v1 = vld [vmem:[%s105_s1] sm:$0xf]  ;;  %vm15_vm1 = vcmp.ne.s32.totalorder %v14_v0, 0 }
   0x3   :  { %57 = vrcp.f32 %v17_v1  ;;  %v55_v3 = vsel %vm15_vm1, 1.0, %v61_v2  ;;  %v16_v9 = vld [vmem:[%s107_s0] sm:$0xf] }
   0x4   :  { %v43_v4 = vsel %vm25_vm0, %v55_v3, 0.0 }
   0x5   :  { %v44_v5 = vrot.slane %v43_v4, 4 }
   0x7   :  { %v45_v6 = vadd.f32 %v44_v5, %v43_v4 }
   0x9   :  { %v46_v7 = vrot.slane %v45_v6, 2 }
   0xb   :  { %v47_v8 = vadd.f32 %v46_v7, %v45_v6 }
   0xd   :  { %v48_v10 = vrot.slane %v47_v8, 1 }
   0xf   :  { %v49_v12 = vadd.f32 %v48_v10, %v47_v8 }
  0x10   :  { %v58_v11 = vpop.eup %57 }
  0x11   :  { %v19_v13 = vmul.f32 %v58_v11, %v16_v9  ;;  %50 = vst [vmem:[%s108_s3 + $0x2] sm:$0x1] %v49_v12 }
  0x13   :  { %v20_v14 = vsel %vm15_vm1, %v19_v13, 1.0 }
  0x14   :  { %59 = vlog2.f32 %v20_v14 }
  0x21   :  { %v60_v15 = vpop.eup %59 }
  0x22   :  { %v22_v16 = vmul.f32 0.6931472, %v60_v15 }
  0x24   :  { %v26_v17 = vsel %vm25_vm0, %v22_v16, 0.0  ;;  %v34_v18 = vmul.f32 %v22_v16, %v22_v16 }
  0x25   :  { %v27_v19 = vrot.slane %v26_v17, 4 }
  0x26   :  { %v35_v20 = vsel %vm25_vm0, %v34_v18, 0.0 }
  0x27   :  { %v28_v21 = vadd.f32 %v27_v19, %v26_v17  ;;  %v36_v22 = vrot.slane %v35_v20, 4 }
  0x29   :  { %v29_v23 = vrot.slane %v28_v21, 2  ;;  %v37_v24 = vadd.f32 %v36_v22, %v35_v20 }
  0x2b   :  { %v30_v25 = vadd.f32 %v29_v23, %v28_v21  ;;  %v38_v26 = vrot.slane %v37_v24, 2 }
  0x2d   :  { %v31_v27 = vrot.slane %v30_v25, 1  ;;  %v39_v28 = vadd.f32 %v38_v26, %v37_v24 }
  0x2f   :  { %v32_v29 = vadd.f32 %v31_v27, %v30_v25  ;;  %v40_v30 = vrot.slane %v39_v28, 1 }
  0x31   :  { %33 = vst [vmem:[%s108_s3] sm:$0x1] %v32_v29  ;;  %v41_v31 = vadd.f32 %v40_v30, %v39_v28 }
  0x33   :  { %42 = vst [vmem:[%s108_s3 + $0x1] sm:$0x1] %v41_v31 }

</bundles_post_ra>
